<compile_context>
chip_gen: v7x
topology: tpu7x:2x2x1
jax: 0.10.0
libtpu: 0.0.40
codegen_flags: <defaults>
</compile_context>

<pallas_src>
import jax
import jax.numpy as jnp
from jax.experimental import pallas as pl
from jax.experimental.pallas import tpu as pltpu


def _fcu_kernel(x_ref, w_ref, b_ref, o_ref):
    # x_ref: (Cin, t_hw)  activation tile (io dtype), spatial on lanes
    # w_ref: (Cout, Cin)  f32 conv weight with BN scale pre-folded
    # b_ref: (Cout, 1)    f32 folded conv-bias + BN shift
    # o_ref: (Cout, t_hw) NCHW output tile (lane-dense, io dtype)
    x = x_ref[...].astype(jnp.float32)              # cheap VPU cast; DMA is the bottleneck
    y = jnp.dot(w_ref[...], x, preferred_element_type=jnp.float32)
    y = y + b_ref[...]                              # broadcast over spatial lanes
    o_ref[...] = jnp.maximum(y, 0.0).astype(o_ref.dtype)   # ReLU


def fcu_forward(x_nchw, conv_w, conv_b, bn_gamma, bn_beta, bn_mean, bn_var,
                eps=1e-6, target_step_bytes=2 << 20, vmem_budget_bytes=8 << 20):
    """Forward of FCU: ReLU(BN(Conv1x1(x))). x_nchw: [N, Cin, H, W] (NCHW in/out).

    Activations round-trip HBM in x_nchw.dtype; accumulation is f32."""
    N, Cin, H, W = x_nchw.shape
    Cout = conv_w.shape[0]
    HW = H * W
    io_dtype = x_nchw.dtype
    itemsize = jnp.dtype(io_dtype).itemsize

    # Flatten spatial only (contiguous reshape, no transpose / extra HBM pass).
    # No padding: Pallas clips the edge block if HW is not a multiple of t_hw.
    x3d = x_nchw.reshape(N, Cin, HW)

    # Fold BatchNorm (eval) into the tiny weight/bias:
    #   bn(conv(x)) = scale * (W @ x + b_conv - mean) + beta
    #               = (scale[:,None] * W) @ x + (scale*(b_conv - mean) + beta)
    scale = (bn_gamma / jnp.sqrt(bn_var + eps)).astype(jnp.float32)              # (Cout,)
    w = conv_w.reshape(Cout, Cin).astype(jnp.float32) * scale[:, None]           # (Cout, Cin)
    bias = (scale * (conv_b.astype(jnp.float32) - bn_mean) + bn_beta)            # (Cout,)
    bias = bias.astype(jnp.float32).reshape(Cout, 1)

    # --- spatial tile size: bytes-per-step target, VMEM budget, grid >= 2 ---------
    HW_lanes = pl.cdiv(HW, 128) * 128                 # lane-rounded spatial extent
    cin_pad = pl.cdiv(Cin, 8) * 8                     # sublane-padded Cin footprint
    bytes_per_lane = (cin_pad + Cout) * itemsize      # in + out bytes per spatial lane
    t_hw = (target_step_bytes // bytes_per_lane) // 128 * 128
    max_by_vmem = (vmem_budget_bytes // (2 * bytes_per_lane)) // 128 * 128  # double-buffered
    t_hw = max(128, min(t_hw, max_by_vmem, HW_lanes))
    if N == 1 and t_hw >= HW_lanes and HW_lanes >= 256:
        # Ensure >=2 grid steps so both v7x TensorCores get work.
        t_hw = pl.cdiv(HW_lanes // 2, 128) * 128
    grid = (N, pl.cdiv(HW, t_hw))

    cost = pl.CostEstimate(
        flops=2 * N * Cout * Cin * HW,
        transcendentals=0,
        bytes_accessed=N * HW * (Cin + Cout) * itemsize,
    )

    out3d = pl.pallas_call(
        _fcu_kernel,
        out_shape=jax.ShapeDtypeStruct((N, Cout, HW), io_dtype),
        grid_spec=pltpu.PrefetchScalarGridSpec(
            num_scalar_prefetch=0,
            grid=grid,
            in_specs=[
                # (batch squeezed, full Cin, spatial tile) -- spatial on lanes
                pl.BlockSpec((None, Cin, t_hw), lambda n, j: (n, 0, j)),
                pl.BlockSpec((Cout, Cin), lambda n, j: (0, 0)),   # folded weight (f32)
                pl.BlockSpec((Cout, 1), lambda n, j: (0, 0)),     # folded bias (f32)
            ],
            out_specs=pl.BlockSpec((None, Cout, t_hw), lambda n, j: (n, 0, j)),
        ),
        compiler_params=pltpu.CompilerParams(
            dimension_semantics=("parallel", "parallel")),
        cost_estimate=cost,
    )(x3d, w, bias)

    return out3d.reshape(N, Cout, H, W)


if __name__ == "__main__":
    # Small shapes consistent with the module: inplanes=4, outplanes=8
    N, Cin, Cout, H, Wd = 2, 4, 8, 16, 16

    key = jax.random.PRNGKey(0)
    kx, kw, kb, kg, kbe, km, kv = jax.random.split(key, 7)

    # Activations in bf16 (HBM round-trip dtype); parameters in f32.
    x = jax.random.normal(kx, (N, Cin, H, Wd), dtype=jnp.float32).astype(jnp.bfloat16)

    conv_w = jax.random.normal(kw, (Cout, Cin, 1, 1), dtype=jnp.float32) * 0.1
    conv_b = jax.random.normal(kb, (Cout,), dtype=jnp.float32) * 0.1
    bn_gamma = 1.0 + 0.1 * jax.random.normal(kg, (Cout,), dtype=jnp.float32)
    bn_beta = 0.1 * jax.random.normal(kbe, (Cout,), dtype=jnp.float32)
    bn_mean = 0.1 * jax.random.normal(km, (Cout,), dtype=jnp.float32)
    bn_var = jnp.abs(jax.random.normal(kv, (Cout,), dtype=jnp.float32)) + 0.5

    out = fcu_forward(x, conv_w, conv_b, bn_gamma, bn_beta, bn_mean, bn_var, eps=1e-6)
    out = jax.block_until_ready(out)

    # Pure-JAX reference (same bf16 activations, f32 math) of the fused op.
    xf = x.astype(jnp.float32)
    x_nhwc = jnp.transpose(xf, (0, 2, 3, 1))
    y_ref = jnp.einsum("nhwc,oc->nhwo", x_nhwc, conv_w.reshape(Cout, Cin)) + conv_b
    y_ref = (y_ref - bn_mean) / jnp.sqrt(bn_var + 1e-6) * bn_gamma + bn_beta
    y_ref = jnp.maximum(y_ref, 0.0)
    y_ref = jnp.transpose(y_ref, (0, 3, 1, 2))

    assert out.shape == (N, Cout, H, Wd)
    assert out.dtype == x.dtype
    assert jnp.allclose(out.astype(jnp.float32), y_ref, atol=2e-2, rtol=2e-2), \
        "mismatch vs reference"

    print("KERNEL_OK")
</pallas_src>

<mosaic_0001>
module attributes {stable_mosaic.version = 11 : i64} {
  func.func @_fcu_kernel(%arg0: i32, %arg1: i32, %arg2: memref<1x4x256xbf16, #tpu.memory_space<vmem>>, %arg3: memref<8x4xf32, #tpu.memory_space<vmem>>, %arg4: memref<8x1xf32, #tpu.memory_space<vmem>>, %arg5: memref<1x8x256xbf16, #tpu.memory_space<vmem>>) attributes {dimension_semantics = [#tpu.dimension_semantics<parallel>, #tpu.dimension_semantics<parallel>], iteration_bounds = array<i64: 2, 1>, scalar_prefetch = 0 : i64, scratch_operands = 0 : i64, tpu.core_type = #tpu.core_type<tc>, window_params = [{transform_indices = @transform_0, window_bounds = array<i64: 1, 4, 256>}, {pipeline_mode = #tpu.pipeline_mode<synchronous>, transform_indices = @transform_1, window_bounds = array<i64: 8, 4>}, {pipeline_mode = #tpu.pipeline_mode<synchronous>, transform_indices = @transform_2, window_bounds = array<i64: 8, 1>}, {transform_indices = @transform_3, window_bounds = array<i64: 1, 8, 256>}]} {
    %c0 = arith.constant 0 : index
    %c0_0 = arith.constant 0 : index
    %c0_1 = arith.constant 0 : index
    %0 = vector.load %arg2[%c0, %c0_0, %c0_1] : memref<1x4x256xbf16, #tpu.memory_space<vmem>>, vector<1x4x256xbf16>
    %1 = vector.shape_cast %0 : vector<1x4x256xbf16> to vector<4x256xbf16>
    %2 = arith.extf %1 : vector<4x256xbf16> to vector<4x256xf32>
    %c0_2 = arith.constant 0 : index
    %c0_3 = arith.constant 0 : index
    %3 = vector.load %arg3[%c0_2, %c0_3] : memref<8x4xf32, #tpu.memory_space<vmem>>, vector<8x4xf32>
    %cst = arith.constant dense<0.000000e+00> : vector<8x256xf32>
    %4 = tpu.matmul %3, %2, %cst {dimension_numbers = #tpu.dot_dimension_numbers<[1], [0], [0], [1], [0, 0, 1, 1], [], []>} : vector<8x4xf32>, vector<4x256xf32>, vector<8x256xf32> -> vector<8x256xf32>
    %c0_4 = arith.constant 0 : index
    %c0_5 = arith.constant 0 : index
    %5 = vector.load %arg4[%c0_4, %c0_5] : memref<8x1xf32, #tpu.memory_space<vmem>>, vector<8x1xf32>
    %6 = vector.broadcast %5 : vector<8x1xf32> to vector<8x256xf32>
    %7 = arith.addf %4, %6 : vector<8x256xf32>
    %cst_6 = arith.constant 0.000000e+00 : f32
    %8 = vector.broadcast %cst_6 : f32 to vector<8x256xf32>
    %9 = arith.maximumf %7, %8 : vector<8x256xf32>
    %10 = arith.truncf %9 : vector<8x256xf32> to vector<8x256xbf16>
    %c0_7 = arith.constant 0 : index
    %c0_8 = arith.constant 0 : index
    %c0_9 = arith.constant 0 : index
    %11 = vector.load %arg5[%c0_7, %c0_8, %c0_9] : memref<1x8x256xbf16, #tpu.memory_space<vmem>>, vector<1x8x256xbf16>
    %12 = vector.shape_cast %11 : vector<1x8x256xbf16> to vector<8x256xbf16>
    %13 = vector.shape_cast %10 : vector<8x256xbf16> to vector<1x8x256xbf16>
    tpu.vector_store %arg5[%c0_7, %c0_8, %c0_9], %13 {strides = array<i32>} : memref<1x8x256xbf16, #tpu.memory_space<vmem>>, vector<1x8x256xbf16>,
    return
  }
  func.func @transform_0(%arg0: i32, %arg1: i32) -> (i32, i32, i32) {
    %c0_i32 = arith.constant 0 : i32
    %c0_i32_0 = arith.constant 0 : i32
    return %arg0, %c0_i32, %arg1 : i32, i32, i32
  }
  func.func @transform_1(%arg0: i32, %arg1: i32) -> (i32, i32) {
    %c0_i32 = arith.constant 0 : i32
    %c0_i32_0 = arith.constant 0 : i32
    %c0_i32_1 = arith.constant 0 : i32
    return %c0_i32, %c0_i32_0 : i32, i32
  }
  func.func @transform_2(%arg0: i32, %arg1: i32) -> (i32, i32) {
    %c0_i32 = arith.constant 0 : i32
    %c0_i32_0 = arith.constant 0 : i32
    %c0_i32_1 = arith.constant 0 : i32
    return %c0_i32, %c0_i32_0 : i32, i32
  }
  func.func @transform_3(%arg0: i32, %arg1: i32) -> (i32, i32, i32) {
    %c0_i32 = arith.constant 0 : i32
    %c0_i32_0 = arith.constant 0 : i32
    return %arg0, %c0_i32, %arg1 : i32, i32, i32
  }
}

</mosaic_0001>

<bundles_post_ra>
// kernel: tpu_custom_call.1
= control target key start
LH: loop header
LB: loop body
LE: loop exit
PB: predicated region body
PF: predicated region fallthrough
CT: control target
= control target key end

     0   :  { %8 = vsyncpa [#allocation3], 0  ;;  %s694_s0 = inlined_call_operand.vmem [shape: bf16[2,4,256], index: 0, kind: input, shape index: {}]   ;;  %s695_s1 = inlined_call_operand.vmem [shape: f32[8,4], index: 1, kind: input, shape index: {}]   ;;  %s696_s2 = inlined_call_operand.vmem [shape: f32[8,1], index: 2, kind: input, shape index: {}]   ;;  %s697_s3 = inlined_call_operand.hbm [shape: bf16[2,8,256], index: 3, kind: output, shape index: {}]  }
   0x1   :  { %10 = vsyncpa [#allocation3 + $0x1], 0  ;;  %s576_s12 = smov 0   ;;  %s578_s13 = smov 0  }
   0x2   :  { %s580_s14 = smov 0   ;;  %s582_s15 = smov 0  }
   0x3   :  { %s584_s16 = smov 0   ;;  %s586_s17 = smov 0  }
   0x4 LB: > { %s395_s18 = sadd.s32 4294967295, %s551_s17   ;;  %s396_s19 = sadd.s32 4294967294, %s551_s17   ;;  %s551_s17 = sphi %s586_s17, %s16_s17   ;;  %s547_s16 = sphi %s584_s16, %s704_s16   ;;  %s543_s15 = sphi %s582_s15, %s703_s15   ;;  %s539_s14 = sphi %s580_s14, %s702_s14   ;;  %s535_s13 = sphi %s578_s13, %s701_s13   ;;  %s531_s12 = sphi %s576_s12, %s700_s12  }
   0x5   : > { %s28_s20 = sadd.s32 1, %s547_s16  ;;  %s107_s21 = sadd.s32 1, %s539_s14 }
   0x6   : > { %p30_p0 = scmp.ge.s32.totalorder %s28_s20, 2  ;;  %p117_p1 = scmp.ne.s32.totalorder %s539_s14, %s535_s13 }
   0x7   : > { %p118_p2 = scmp.eq.s32.totalorder %s395_s18, 1  ;;  %p123_p3 = scmp.ne.s32.totalorder %s535_s13, %s531_s12 }
   0x8   : > { %s706_s20 = smov (%p30_p0, %s28_s20), 0  ;;  %p124_p5 = scmp.eq.s32.totalorder %s396_s19, 1 }
   0x9   : > { %p616_p4 = por %p118_p2, %p117_p1  ;;  %s102_s23 = ssub.s32 %s547_s16, %s706_s20 }
   0xa   : > { %p399_p6 = scmp.ge.s32.totalorder %s551_s17, 1  ;;  %p105_p7 = scmp.eq.s32.totalorder %s102_s23, 0 }
   0xb   : > { %p623_p8 = por %p124_p5, %p123_p3  ;;  %p161_p9 = scmp.lt.s32.totalorder %s551_s17, 3 }
   0xc   : > { %s629_s25 = scalar_select %p105_p7, %s539_s14, %s107_s21  }
   0xd   : > { %p162_p10 = pnand %p399_p6, %p161_p9 }
   0xe   : > { %p190_p11 = scmp.lt.s32.totalorder (!%p162_p10), %s543_s15, 1  ;;  %v553_v0 = vmov (!%p162_p10), 0.0   ;;  %v554_v1 = vmov (!%p162_p10), 0   ;;  %v203_v2 = vld [vmem:[%s696_s2] sm:$0xff] (!%p162_p10)  ;;  %vm215_vm0 = vcmask (!%p162_p10), 1043456   ;;  %vm211_vm1 = vcmask (!%p162_p10), 31744  }
   0xf   : > { %165 = sbr.rel (%p162_p10) target bundleno = 266 (0x10a), region = 32  ;;  %284 = vmatprep.mubr.f32.mxu0 (!%p162_p10), %v553_v0  ;;  %472 = vset.pattern.permute.xlu0 (!%p162_p10), %v554_v1  ;;  %v202_v6 = vld [vmem:[%s695_s1] sm:$0xff] (!%p162_p10)  ;;  %s186_s8 = sand.u32 (!%p162_p10), 1, %s535_s13  }
  0x10   : > { %206 = vperm.xlu0 (!%p162_p10), %472, %v203_v2   ;;  %s400_s9 = sshll.u32 (!%p162_p10), %s186_s8, 3  ;;  %s414_s10 = sshll.u32 (!%p162_p10), %s543_s15, 7 }
  0x11   : > { %s188_s11 = scalar_lea.vmem (!%p162_p10), [#allocation2], %s400_s9  ;;  %s647_s23 = scalar_lea.hbm (!%p162_p10), %s697_s3, %s414_s10 }
  0x12   : > { %s319_s18 = sshll.u32 (!%p162_p10), %s188_s11, 4  ;;  %s303_s26 = scalar_lea.sflag (!%p162_p10), [#allocation3], %s186_s8  ;;  %s649_s18 = int_to_ptr.vmem [resolvable:$true] %s319_s18 }
  0x13   : > { %s473_s27 = scalar_lea.vmem (!%p162_p10), %s649_s18, 128 }
  0x14   : > { %p474_p12 = scmp.ne.s32.totalorder (!%p162_p10), %s649_s18, %s473_s27 }
  0x16   : > { %s191_s28 = scalar_select %p190_p11, %s543_s15, 1 }
  0x17   : > { %p475_p13 = pnand %p474_p12, %p616_p4  ;;  %s555_s15 = smov [#allocation2]  }
  0x18   : > { %s412_s29 = sshll.u32 %s191_s28, 2  ;;  %s477_s28 = sshll.u32 %s555_s15, 4  ;;  %s478_s28 = int_to_ptr.vmem [resolvable:$false] %s477_s28 }
  0x19   : > { %s197_s5 = scalar_lea.vmem %s694_s0, %s412_s29  ;;  %p476_p0 = pneg %p475_p13 }
  0x1a   : > { %v200_v3 = vld [vmem:[%s197_s5] sm:$0xf]  ;;  %s479_s29 = scalar_lea.vmem %s478_s28, 256  ;;  %p480_p1 = scmp.lt.s32.totalorder %s649_s18, %s478_s28 }
  0x1b   : > { %v201_v4 = vunpack.c.l.bf16 %v200_v3  ;;  %p481_p2 = scmp.lt.s32.totalorder %s479_s29, %s473_s27 }
  0x1d   : > { %v210_v5 = vcombine.high %v201_v4, %v201_v4  ;;  %p482_p3 = por %p481_p2, %p480_p1 }
  0x1f   : > { %403 = vmatprep.subr.msk.mxu0 %vm215_vm0, %v210_v5  ;;  %p483_p5 = pnand %p482_p3, %p476_p0 }
  0x20   : > { %404 = vmatpush1.msk.msra.mxu0 %vm215_vm0, %v201_v4 }
  0x21   : > { %405 = vmatmul.mubr.msk.f32.vlgmr.msra.gmra.mrb[0].mxu0 %vm211_vm1, %v202_v6 }
  0x8f   : > { %v207_v7 = vpop.permute.xlu0 %206 }
  0xf4   : > { %v286_v8 = vpop.f32.mrb[0].mxu0 }
  0xf5   : > { %v287_v9 = vadd.f32 %v286_v8, %v207_v7  ;;  %v288_v10 = vpop.f32.mrb[1].mxu0 }
  0xf6   : > { %v289_v11 = vadd.f32 %v288_v10, %v207_v7 }
  0xf7   : > { %v291_v12 = vmax.f32 %v287_v9, 0.0 }
  0xf8   : > { %v292_v13 = vmax.f32 %v289_v11, 0.0 }
  0xfa   : > { %v413_v14 = vpack.c.bf16 %v292_v13, %v291_v12 }
  0xfc   : > { %301 = vst [vmem:[%s188_s11] sm:$0xff] %v413_v14 }
  0xfd   : > { %486 = shalt.err (!%p483_p5)
}
  0xfe   : > { %s487_s30 = scalar_lea.hbm %s647_s23, 128  ;;  %s491_s6 = scalar_lea.hbm %s697_s3, 256 }
  0xff   : > { %p488_p6 = scmp.ne.s32.totalorder %s647_s23, %s487_s30  ;;  %p492_p10 = scmp.lt.u32.totalorder %s647_s23, %s697_s3 }
 0x100   : > { %p493_p11 = scmp.lt.u32.totalorder %s491_s6, %s487_s30  ;;  %p495_p13 = scmp.lt.u32.totalorder %s487_s30, %s647_s23 }
 0x101   : > { %p489_p7 = pnand %p488_p6, %p616_p4 }
 0x102   : > { %p494_p12 = por %p493_p11, %p492_p10 }
 0x103   : > { %p490_p9 = pneg %p489_p7 }
 0x104   : > { %p496_p0 = por %p495_p13, %p494_p12 }
 0x106   : > { %p497_p1 = pnand %p496_p0, %p490_p9 }
 0x108   : > { %500 = shalt.err (!%p497_p1)
}
 0x109   : > { %415 = dma.vmem_to_hbm [thread:$0]  (%p616_p4), %s649_s18, 128, %s647_s23, %s303_s26  }
 0x10a PF: > { %p421_p2 = scmp.ge.s32.totalorder %s551_s17, 2  ;;  %s331_s9 = sand.u32 1, %s531_s12  }
 0x10b   : > { %s332_s10 = scalar_lea.sflag [#allocation3], %s331_s9 }
 0x10c   : > { %p418_p3 = pnand %p421_p2, %p623_p8 }
 0x10e   : > { %526 = dma.done.wait (!%p418_p3), %s332_s10, 128  }
 0x10f   : > { %528 = vsyncadd (!%p418_p3), %s332_s10, 4294967168  ;;  %s16_s17 = sadd.s32 1, %s551_s17   ;;  %s700_s12 = smov %s535_s13 }
 0x110   : > { %p13_p5 = scmp.ge.s32.totalorder %s16_s17, 4   ;;  %s701_s13 = smov %s539_s14 }
 0x111   : > { %s702_s14 = smov %s629_s25  ;;  %s703_s15 = smov %s547_s16 }
 0x112   : > { %s704_s16 = smov %s706_s20  ;;  %15 = sbr.rel (!%p13_p5) target bundleno = 4 (0x4), region = 67 }
 0x119   :  { %337 = vsyncpa [#allocation3], 1 }
 0x11a   :  { %339 = vsyncpa [#allocation3 + $0x1], 1 }

</bundles_post_ra>
